<compile_context>
chip_gen: v6e
topology: v6e:2x2x1
jax: 0.10.0
libtpu: 0.0.40
codegen_flags: <defaults>
</compile_context>

<pallas_src>
import jax
import jax.numpy as jnp
from jax.experimental import pallas as pl
from jax.experimental.pallas import tpu as pltpu


def _downsample_kernel(x_ref, w_ref, b_ref, o_ref):
    # x_ref: (1, Ho+1, 2, Wh, 2*C1)  packed, zero-padded input image
    # w_ref: (3, 2, 2*C1, C2p)       packed conv weights
    # b_ref: (1, C2p)                bias (zero-padded to C2p)
    # o_ref: (1, Ho*Wo, C2p)         flattened output image
    hop1 = x_ref.shape[1]
    wh = x_ref.shape[3]
    k2 = x_ref.shape[4]                 # = 2 * C1
    ho, wo = hop1 - 1, wh - 1
    m, c2p = o_ref.shape[1], o_ref.shape[2]

    acc = jnp.zeros((m, c2p), jnp.float32)
    for ky in range(3):
        # padded input row 2*oy + ky  <->  packed (row = oy + roff, phase = ph)
        roff, ph = ky // 2, ky % 2
        for g in range(2):              # g=0: taps kx=0,1 ; g=1: tap kx=2 (+zero pad)
            tap = x_ref[0, roff:roff + ho, ph, g:g + wo, :]      # (Ho, Wo, 2*C1)
            acc = acc + jnp.dot(tap.reshape(m, k2), w_ref[ky, g],
                                preferred_element_type=jnp.float32)
    o_ref[0] = (acc + b_ref[...]).astype(o_ref.dtype)


def _round_up(v, m):
    return (v + m - 1) // m * m


@jax.jit
def downsample(x, weight, bias):
    """x: (B, H, W, C1) NHWC.  weight: (C2, C1, 3, 3) (PyTorch layout).
    bias: (C2,).  Returns (B, Ho, Wo, C2) with Ho/Wo = PyTorch's floor formula."""
    B, H, W, C1 = x.shape
    C2 = weight.shape[0]
    Ho = (H + 2 - 3) // 2 + 1
    Wo = (W + 2 - 3) // 2 + 1
    Hp, Wp = 2 * Ho + 2, 2 * Wo + 2        # even padded spatial dims
    Wh = Wp // 2                           # = Wo + 1
    C2p = _round_up(C2, 128)               # lane-dense output stores
    M = Ho * Wo

    # --- glue: zero-pad (top/left = 1) then FREE repack reshape ---------------
    xp = jnp.pad(x, ((0, 0), (1, Hp - H - 1), (1, Wp - W - 1), (0, 0)))
    # row-major bitcast: (B, Hp, Wp, C1) -> (B, Ho+1, 2, Wh, 2*C1)
    xpk = xp.reshape(B, Ho + 1, 2, Wh, 2 * C1)

    # --- weights: (C2, C1, 3, 3) -> (ky, kx, C1, C2p), packed per column-pair -
    w = jnp.transpose(weight, (2, 3, 1, 0)).astype(x.dtype)      # (3, 3, C1, C2)
    w = jnp.pad(w, ((0, 0), (0, 0), (0, 0), (0, C2p - C2)))      # (3, 3, C1, C2p)
    w01 = jnp.concatenate([w[:, 0], w[:, 1]], axis=1)            # (3, 2*C1, C2p)
    w2 = jnp.concatenate([w[:, 2], jnp.zeros_like(w[:, 2])], axis=1)
    wpk = jnp.stack([w01, w2], axis=1)                           # (3, 2, 2*C1, C2p)
    biasp = jnp.pad(bias, (0, C2p - C2)).astype(jnp.float32).reshape(1, C2p)

    # --- VMEM budget (double-buffered blocks + f32 scratch), capped for v7x ---
    itemsize = jnp.dtype(x.dtype).itemsize
    x_blk = (Ho + 1) * 2 * Wh * 2 * C1 * itemsize
    o_blk = M * C2p * itemsize
    w_blk = 3 * 2 * (2 * C1) * C2p * itemsize
    scratch = 4 * (M * C2p + M * 2 * C1) * 4
    need = 2 * (x_blk + o_blk + w_blk) + scratch + (2 << 20)
    vmem_limit = int(min(max(need, 32 << 20), 48 << 20))

    out = pl.pallas_call(
        _downsample_kernel,
        out_shape=jax.ShapeDtypeStruct((B, M, C2p), x.dtype),
        grid_spec=pltpu.PrefetchScalarGridSpec(
            num_scalar_prefetch=0,
            grid=(B,),
            in_specs=[
                pl.BlockSpec((1, Ho + 1, 2, Wh, 2 * C1),
                             lambda b: (b, 0, 0, 0, 0)),
                pl.BlockSpec((3, 2, 2 * C1, C2p), lambda b: (0, 0, 0, 0)),
                pl.BlockSpec((1, C2p), lambda b: (0, 0)),
            ],
            out_specs=pl.BlockSpec((1, M, C2p), lambda b: (b, 0, 0)),
        ),
        compiler_params=pltpu.CompilerParams(
            dimension_semantics=("parallel",),
            vmem_limit_bytes=vmem_limit,
        ),
    )(xpk, wpk, biasp)

    out = out.reshape(B, Ho, Wo, C2p)
    return out[..., :C2] if C2p != C2 else out


if __name__ == "__main__":
    B, H, W, C1, C2 = 2, 16, 16, 4, 8

    key = jax.random.PRNGKey(0)
    kx, kw, kb = jax.random.split(key, 3)
    x = jax.random.normal(kx, (B, H, W, C1), dtype=jnp.float32)
    # deterministic synthetic params (Conv2d(c1, c2, 3, 2, 1) shapes)
    weight = jax.random.normal(kw, (C2, C1, 3, 3), dtype=jnp.float32) * 0.1
    bias = jax.random.normal(kb, (C2,), dtype=jnp.float32) * 0.1

    y = jax.block_until_ready(downsample(x, weight, bias))

    # reference: XLA conv in NHWC / HWIO
    ref = jax.lax.conv_general_dilated(
        x,
        jnp.transpose(weight, (2, 3, 1, 0)),     # (3, 3, C1, C2)
        window_strides=(2, 2),
        padding=((1, 1), (1, 1)),
        dimension_numbers=("NHWC", "HWIO", "NHWC"),
    ) + bias.reshape(1, 1, 1, C2)

    assert y.shape == (B, (H + 1) // 2, (W + 1) // 2, C2), y.shape
    assert jnp.allclose(y, ref, atol=1e-4, rtol=1e-4), float(
        jnp.max(jnp.abs(y - ref))
    )
    print("KERNEL_OK")
</pallas_src>

<mosaic_0001>
module attributes {stable_mosaic.version = 11 : i64} {
  func.func @_downsample_kernel(%arg0: i32, %arg1: memref<1x9x2x9x8xf32, #tpu.memory_space<vmem>>, %arg2: memref<3x2x8x128xf32, #tpu.memory_space<vmem>>, %arg3: memref<1x128xf32, #tpu.memory_space<vmem>>, %arg4: memref<1x64x128xf32, #tpu.memory_space<vmem>>) attributes {dimension_semantics = [#tpu.dimension_semantics<parallel>], iteration_bounds = array<i64: 2>, scalar_prefetch = 0 : i64, scratch_operands = 0 : i64, tpu.core_type = #tpu.core_type<tc>, window_params = [{transform_indices = @transform_0, window_bounds = array<i64: 1, 9, 2, 9, 8>}, {pipeline_mode = #tpu.pipeline_mode<synchronous>, transform_indices = @transform_1, window_bounds = array<i64: 3, 2, 8, 128>}, {pipeline_mode = #tpu.pipeline_mode<synchronous>, transform_indices = @transform_2, window_bounds = array<i64: 1, 128>}, {transform_indices = @transform_3, window_bounds = array<i64: 1, 64, 128>}]} {
    %cst = arith.constant 0.000000e+00 : f32
    %0 = vector.broadcast %cst : f32 to vector<64x128xf32>
    %c0 = arith.constant 0 : index
    %c0_0 = arith.constant 0 : index
    %c0_1 = arith.constant 0 : index
    %c0_2 = arith.constant 0 : index
    %c0_3 = arith.constant 0 : index
    %1 = vector.load %arg1[%c0, %c0_0, %c0_1, %c0_2, %c0_3] : memref<1x9x2x9x8xf32, #tpu.memory_space<vmem>>, vector<1x8x1x8x8xf32>
    %2 = vector.shape_cast %1 : vector<1x8x1x8x8xf32> to vector<8x8x8xf32>
    %3 = vector.shape_cast %2 : vector<8x8x8xf32> to vector<64x8xf32>
    %c0_4 = arith.constant 0 : index
    %c0_5 = arith.constant 0 : index
    %c0_6 = arith.constant 0 : index
    %c0_7 = arith.constant 0 : index
    %4 = vector.load %arg2[%c0_4, %c0_5, %c0_6, %c0_7] : memref<3x2x8x128xf32, #tpu.memory_space<vmem>>, vector<1x1x8x128xf32>
    %5 = vector.shape_cast %4 : vector<1x1x8x128xf32> to vector<8x128xf32>
    %cst_8 = arith.constant dense<0.000000e+00> : vector<64x128xf32>
    %6 = tpu.matmul %3, %5, %cst_8 {dimension_numbers = #tpu.dot_dimension_numbers<[1], [0], [0], [1], [0, 0, 1, 1], [], []>} : vector<64x8xf32>, vector<8x128xf32>, vector<64x128xf32> -> vector<64x128xf32>
    %7 = arith.addf %0, %6 : vector<64x128xf32>
    %c0_9 = arith.constant 0 : index
    %c0_10 = arith.constant 0 : index
    %c0_11 = arith.constant 0 : index
    %c1 = arith.constant 1 : index
    %c0_12 = arith.constant 0 : index
    %8 = vector.load %arg1[%c0_9, %c0_10, %c0_11, %c1, %c0_12] : memref<1x9x2x9x8xf32, #tpu.memory_space<vmem>>, vector<1x8x1x8x8xf32>
    %9 = vector.shape_cast %8 : vector<1x8x1x8x8xf32> to vector<8x8x8xf32>
    %10 = vector.shape_cast %9 : vector<8x8x8xf32> to vector<64x8xf32>
    %c0_13 = arith.constant 0 : index
    %c1_14 = arith.constant 1 : index
    %c0_15 = arith.constant 0 : index
    %c0_16 = arith.constant 0 : index
    %11 = vector.load %arg2[%c0_13, %c1_14, %c0_15, %c0_16] : memref<3x2x8x128xf32, #tpu.memory_space<vmem>>, vector<1x1x8x128xf32>
    %12 = vector.shape_cast %11 : vector<1x1x8x128xf32> to vector<8x128xf32>
    %cst_17 = arith.constant dense<0.000000e+00> : vector<64x128xf32>
    %13 = tpu.matmul %10, %12, %cst_17 {dimension_numbers = #tpu.dot_dimension_numbers<[1], [0], [0], [1], [0, 0, 1, 1], [], []>} : vector<64x8xf32>, vector<8x128xf32>, vector<64x128xf32> -> vector<64x128xf32>
    %14 = arith.addf %7, %13 : vector<64x128xf32>
    %c0_18 = arith.constant 0 : index
    %c0_19 = arith.constant 0 : index
    %c1_20 = arith.constant 1 : index
    %c0_21 = arith.constant 0 : index
    %c0_22 = arith.constant 0 : index
    %15 = vector.load %arg1[%c0_18, %c0_19, %c1_20, %c0_21, %c0_22] : memref<1x9x2x9x8xf32, #tpu.memory_space<vmem>>, vector<1x8x1x8x8xf32>
    %16 = vector.shape_cast %15 : vector<1x8x1x8x8xf32> to vector<8x8x8xf32>
    %17 = vector.shape_cast %16 : vector<8x8x8xf32> to vector<64x8xf32>
    %c1_23 = arith.constant 1 : index
    %c0_24 = arith.constant 0 : index
    %c0_25 = arith.constant 0 : index
    %c0_26 = arith.constant 0 : index
    %18 = vector.load %arg2[%c1_23, %c0_24, %c0_25, %c0_26] : memref<3x2x8x128xf32, #tpu.memory_space<vmem>>, vector<1x1x8x128xf32>
    %19 = vector.shape_cast %18 : vector<1x1x8x128xf32> to vector<8x128xf32>
    %cst_27 = arith.constant dense<0.000000e+00> : vector<64x128xf32>
    %20 = tpu.matmul %17, %19, %cst_27 {dimension_numbers = #tpu.dot_dimension_numbers<[1], [0], [0], [1], [0, 0, 1, 1], [], []>} : vector<64x8xf32>, vector<8x128xf32>, vector<64x128xf32> -> vector<64x128xf32>
    %21 = arith.addf %14, %20 : vector<64x128xf32>
    %c0_28 = arith.constant 0 : index
    %c0_29 = arith.constant 0 : index
    %c1_30 = arith.constant 1 : index
    %c1_31 = arith.constant 1 : index
    %c0_32 = arith.constant 0 : index
    %22 = vector.load %arg1[%c0_28, %c0_29, %c1_30, %c1_31, %c0_32] : memref<1x9x2x9x8xf32, #tpu.memory_space<vmem>>, vector<1x8x1x8x8xf32>
    %23 = vector.shape_cast %22 : vector<1x8x1x8x8xf32> to vector<8x8x8xf32>
    %24 = vector.shape_cast %23 : vector<8x8x8xf32> to vector<64x8xf32>
    %c1_33 = arith.constant 1 : index
    %c1_34 = arith.constant 1 : index
    %c0_35 = arith.constant 0 : index
    %c0_36 = arith.constant 0 : index
    %25 = vector.load %arg2[%c1_33, %c1_34, %c0_35, %c0_36] : memref<3x2x8x128xf32, #tpu.memory_space<vmem>>, vector<1x1x8x128xf32>
    %26 = vector.shape_cast %25 : vector<1x1x8x128xf32> to vector<8x128xf32>
    %cst_37 = arith.constant dense<0.000000e+00> : vector<64x128xf32>
    %27 = tpu.matmul %24, %26, %cst_37 {dimension_numbers = #tpu.dot_dimension_numbers<[1], [0], [0], [1], [0, 0, 1, 1], [], []>} : vector<64x8xf32>, vector<8x128xf32>, vector<64x128xf32> -> vector<64x128xf32>
    %28 = arith.addf %21, %27 : vector<64x128xf32>
    %c0_38 = arith.constant 0 : index
    %c1_39 = arith.constant 1 : index
    %c0_40 = arith.constant 0 : index
    %c0_41 = arith.constant 0 : index
    %c0_42 = arith.constant 0 : index
    %29 = vector.load %arg1[%c0_38, %c1_39, %c0_40, %c0_41, %c0_42] : memref<1x9x2x9x8xf32, #tpu.memory_space<vmem>>, vector<1x8x1x8x8xf32>
    %30 = vector.shape_cast %29 : vector<1x8x1x8x8xf32> to vector<8x8x8xf32>
    %31 = vector.shape_cast %30 : vector<8x8x8xf32> to vector<64x8xf32>
    %c2 = arith.constant 2 : index
    %c0_43 = arith.constant 0 : index
    %c0_44 = arith.constant 0 : index
    %c0_45 = arith.constant 0 : index
    %32 = vector.load %arg2[%c2, %c0_43, %c0_44, %c0_45] : memref<3x2x8x128xf32, #tpu.memory_space<vmem>>, vector<1x1x8x128xf32>
    %33 = vector.shape_cast %32 : vector<1x1x8x128xf32> to vector<8x128xf32>
    %cst_46 = arith.constant dense<0.000000e+00> : vector<64x128xf32>
    %34 = tpu.matmul %31, %33, %cst_46 {dimension_numbers = #tpu.dot_dimension_numbers<[1], [0], [0], [1], [0, 0, 1, 1], [], []>} : vector<64x8xf32>, vector<8x128xf32>, vector<64x128xf32> -> vector<64x128xf32>
    %35 = arith.addf %28, %34 : vector<64x128xf32>
    %c0_47 = arith.constant 0 : index
    %c1_48 = arith.constant 1 : index
    %c0_49 = arith.constant 0 : index
    %c1_50 = arith.constant 1 : index
    %c0_51 = arith.constant 0 : index
    %36 = vector.load %arg1[%c0_47, %c1_48, %c0_49, %c1_50, %c0_51] : memref<1x9x2x9x8xf32, #tpu.memory_space<vmem>>, vector<1x8x1x8x8xf32>
    %37 = vector.shape_cast %36 : vector<1x8x1x8x8xf32> to vector<8x8x8xf32>
    %38 = vector.shape_cast %37 : vector<8x8x8xf32> to vector<64x8xf32>
    %c2_52 = arith.constant 2 : index
    %c1_53 = arith.constant 1 : index
    %c0_54 = arith.constant 0 : index
    %c0_55 = arith.constant 0 : index
    %39 = vector.load %arg2[%c2_52, %c1_53, %c0_54, %c0_55] : memref<3x2x8x128xf32, #tpu.memory_space<vmem>>, vector<1x1x8x128xf32>
    %40 = vector.shape_cast %39 : vector<1x1x8x128xf32> to vector<8x128xf32>
    %cst_56 = arith.constant dense<0.000000e+00> : vector<64x128xf32>
    %41 = tpu.matmul %38, %40, %cst_56 {dimension_numbers = #tpu.dot_dimension_numbers<[1], [0], [0], [1], [0, 0, 1, 1], [], []>} : vector<64x8xf32>, vector<8x128xf32>, vector<64x128xf32> -> vector<64x128xf32>
    %42 = arith.addf %35, %41 : vector<64x128xf32>
    %c0_57 = arith.constant 0 : index
    %c0_58 = arith.constant 0 : index
    %43 = vector.load %arg3[%c0_57, %c0_58] : memref<1x128xf32, #tpu.memory_space<vmem>>, vector<1x128xf32>
    %44 = vector.broadcast %43 : vector<1x128xf32> to vector<64x128xf32>
    %45 = arith.addf %42, %44 : vector<64x128xf32>
    %c0_59 = arith.constant 0 : index
    %c0_60 = arith.constant 0 : index
    %c0_61 = arith.constant 0 : index
    %46 = vector.load %arg4[%c0_59, %c0_60, %c0_61] : memref<1x64x128xf32, #tpu.memory_space<vmem>>, vector<1x64x128xf32>
    %47 = vector.shape_cast %46 : vector<1x64x128xf32> to vector<64x128xf32>
    %48 = vector.shape_cast %45 : vector<64x128xf32> to vector<1x64x128xf32>
    tpu.vector_store %arg4[%c0_59, %c0_60, %c0_61], %48 {strides = array<i32>} : memref<1x64x128xf32, #tpu.memory_space<vmem>>, vector<1x64x128xf32>,
    return
  }
  func.func @transform_0(%arg0: i32) -> (i32, i32, i32, i32, i32) {
    %c0_i32 = arith.constant 0 : i32
    %c0_i32_0 = arith.constant 0 : i32
    %c0_i32_1 = arith.constant 0 : i32
    %c0_i32_2 = arith.constant 0 : i32
    %c0_i32_3 = arith.constant 0 : i32
    return %arg0, %c0_i32, %c0_i32_0, %c0_i32_1, %c0_i32_2 : i32, i32, i32, i32, i32
  }
  func.func @transform_1(%arg0: i32) -> (i32, i32, i32, i32) {
    %c0_i32 = arith.constant 0 : i32
    %c0_i32_0 = arith.constant 0 : i32
    %c0_i32_1 = arith.constant 0 : i32
    %c0_i32_2 = arith.constant 0 : i32
    %c0_i32_3 = arith.constant 0 : i32
    return %c0_i32, %c0_i32_0, %c0_i32_1, %c0_i32_2 : i32, i32, i32, i32
  }
  func.func @transform_2(%arg0: i32) -> (i32, i32) {
    %c0_i32 = arith.constant 0 : i32
    %c0_i32_0 = arith.constant 0 : i32
    %c0_i32_1 = arith.constant 0 : i32
    return %c0_i32, %c0_i32_0 : i32, i32
  }
  func.func @transform_3(%arg0: i32) -> (i32, i32, i32) {
    %c0_i32 = arith.constant 0 : i32
    %c0_i32_0 = arith.constant 0 : i32
    %c0_i32_1 = arith.constant 0 : i32
    return %arg0, %c0_i32, %c0_i32_0 : i32, i32, i32
  }
}

</mosaic_0001>

<bundles_post_ra>
// kernel: downsample.1
= control target key start
LH: loop header
LB: loop body
LE: loop exit
PB: predicated region body
PF: predicated region fallthrough
CT: control target
= control target key end

     0   :  { %8 = vsyncpa [#allocation3], 0  ;;  %s1741_s0 = inlined_call_operand.vmem [shape: f32[2,9,2,9,8], index: 0, kind: input, shape index: {}]   ;;  %s1742_s1 = inlined_call_operand.vmem [shape: f32[3,2,8,128], index: 1, kind: input, shape index: {}]   ;;  %s1743_s2 = inlined_call_operand.vmem [shape: f32[1,128], index: 2, kind: input, shape index: {}]   ;;  %s1744_s3 = inlined_call_operand.hbm [shape: f32[2,64,128], index: 3, kind: output, shape index: {}]  }
   0x1   :  { %10 = vsyncpa [#allocation3 + $0x1], 0  ;;  %s1499_s12 = smov 0   ;;  %s1501_s13 = smov 0  }
   0x2   :  { %s1503_s14 = smov 0   ;;  %s1505_s15 = smov 0  }
   0x3 LB: > { %s1520_s16 = sadd.s32 4294967295, %s1474_s15   ;;  %s1136_s17 = sadd.s32 4294967294, %s1474_s15   ;;  %s1474_s15 = sphi %s1505_s15, %s1750_s15   ;;  %s1470_s14 = sphi %s1503_s14, %s1749_s14   ;;  %s1466_s13 = sphi %s1501_s13, %s1748_s13   ;;  %s1462_s12 = sphi %s1499_s12, %s1747_s12  }
   0x4   : > { %s1524_s18 = sadd.s32 1, %s1474_s15   ;;  %s91_s19 = sadd.s32 1, %s1470_s14 }
   0x5   : > { %s88_s20 = ssub.s32 %s1474_s15, %s1524_s18  ;;  %p101_p0 = scmp.ne.s32.totalorder %s1470_s14, %s1466_s13 }
   0x6   : > { %p89_p1 = scmp.eq.s32.totalorder %s88_s20, 0  ;;  %p102_p2 = scmp.eq.s32.totalorder %s1520_s16, 1 }
   0x7   : > { %p107_p3 = scmp.ne.s32.totalorder %s1466_s13, %s1462_s12  ;;  %p108_p4 = scmp.eq.s32.totalorder %s1136_s17, 1 }
   0x8   : > { %s1535_s21 = scalar_select %p89_p1, %s1470_s14, %s91_s19  }
   0x9   : > { %p1537_p5 = por %p102_p2, %p101_p0  ;;  %p1541_p6 = por %p108_p4, %p107_p3 }
   0xa   : > { %p1139_p7 = scmp.ge.s32.totalorder %s1474_s15, 1  ;;  %p140_p8 = scmp.lt.s32.totalorder %s1474_s15, 3 }
   0xc   : > { %p141_p9 = pnand %p1139_p7, %p140_p8 }
   0xd   : > { %p164_p10 = scmp.lt.s32.totalorder (!%p141_p9), %s1520_s16, 1  ;;  %s161_s20 = sand.u32 (!%p141_p9), 1, %s1466_s13  }
   0xe   : > { %144 = sbr.rel (%p141_p9) target bundleno = 286 (0x11e), region = 32  ;;  %s1140_s24 = sshll.u32 (!%p141_p9), %s161_s20, 6 }
   0xf   : > { %s1680_s27 = scalar_lea.vmem (!%p141_p9), [#allocation2], %s1140_s24  ;;  %s1233_s28 = sshll.u32 (!%p141_p9), %s1520_s16, 10 }
  0x10   : > { %s1074_s29 = sshll.u32 (!%p141_p9), %s1680_s27, 4  ;;  %s1476_s7 = smov (!%p141_p9), [#allocation2]   ;;  %s1695_s29 = int_to_ptr.vmem [resolvable:$true] %s1074_s29 }
  0x11   : > { %s1418_s8 = sshll.u32 (!%p141_p9), %s1476_s7, 4  ;;  %s1419_s8 = int_to_ptr.vmem [resolvable:$false] %s1418_s8 }
  0x12   : > { %p1421_p0 = scmp.lt.s32.totalorder (!%p141_p9), %s1695_s29, %s1419_s8 }
  0x13   : > { %v1142_v0 = vld [vmem:[%s1742_s1 + $0x8] sm:$0xff]  ;;  %v177_v1 = vld [vmem:[%s1742_s1] sm:$0xff]  ;;  %v1167_v2 = vld [vmem:[%s1742_s1 + $0x10] sm:$0xff]  ;;  %s165_s5 = scalar_select %p164_p10, %s1520_s16, 1  ;;  %vm188_vm0 = vcmask 64512  }
  0x14   : > { %1288 = vmatprep.subr.mxu0 %v1142_v0  ;;  %1302 = vmatprep.subr.mxu1 %v177_v1  ;;  %v1184_v3 = vld [vmem:[%s1742_s1 + $0x18] sm:$0xff]  ;;  %v1201_v10 = vld [vmem:[%s1742_s1 + $0x20] sm:$0xff]  ;;  %v1218_v11 = vld [vmem:[%s1742_s1 + $0x28] sm:$0xff]  ;;  %s1701_s16 = scalar_lea.sflag [#allocation3], %s161_s20 }
  0x15   : > { %1289 = vmatpush3.msra.mxu0 %v1142_v0  ;;  %1303 = vmatpush3.msra.mxu1 %v177_v1  ;;  %s1372_s6 = smul.u32 288, %s165_s5  ;;  %s1693_s5 = scalar_lea.hbm %s1744_s3, %s1233_s28 }
  0x16   : > { %1316 = vmatprep.subr.mxu0 %v1167_v2  ;;  %1330 = vmatprep.subr.mxu1 %v1184_v3 }
  0x17   : > { %s1564_s9 = scalar_lea.vmem %s1741_s0, %s1372_s6  ;;  %s1414_s6 = scalar_lea.vmem %s1695_s29, 1024 }
  0x18   : > { %v178_v4 = vld [vmem:[%s1564_s9 + $0x1] sm:$0xff]  ;;  %v1159_v22 = vld [vmem:[%s1564_s9 + $0x10] sm:$0xff]  ;;  %p1415_p11 = scmp.ne.s32.totalorder %s1695_s29, %s1414_s6 }
  0x19   : > { %v169_v5 = vld [vmem:[%s1564_s9] sm:$0xff]  ;;  %1290 = vmatprep.mubr.msk.f32.mxu0 %vm188_vm0, %v178_v4  ;;  %v1176_v23 = vld [vmem:[%s1564_s9 + $0x11] sm:$0xff] }
  0x1a   : > { %v1569_v6 = vld [vmem:[%s1564_s9 + $0x21] sm:$0xff]  ;;  %1304 = vmatprep.mubr.msk.f32.mxu1 %vm188_vm0, %v169_v5  ;;  %v1160_v24 = vld [vmem:[%s1564_s9 + $0x30] sm:$0xff]  ;;  %p1416_p12 = pnand %p1415_p11, %p1537_p5 }
  0x1b   : > { %v1574_v7 = vld [vmem:[%s1564_s9 + $0x20] sm:$0xff]  ;;  %1291 = vmatmul.mubr.msk.f32.vlgmr.msra.gmra.mxu0 %vm188_vm0, %v1569_v6  ;;  %v1177_v25 = vld [vmem:[%s1564_s9 + $0x31] sm:$0xff] }
  0x1c   : > { %v1577_v8 = vld [vmem:[%s1564_s9 + $0x41] sm:$0xff]  ;;  %1305 = vmatmul.mubr.msk.f32.vlgmr.msra.gmra.mxu1 %vm188_vm0, %v1574_v7  ;;  %1317 = vmatpush3.msra.mxu0 %v1167_v2  ;;  %v1161_v26 = vld [vmem:[%s1564_s9 + $0x50] sm:$0xff]  ;;  %p1417_p13 = pneg %p1416_p12 }
  0x1d   : > { %v1580_v9 = vld [vmem:[%s1564_s9 + $0x40] sm:$0xff]  ;;  %1331 = vmatpush3.msra.mxu1 %v1184_v3  ;;  %1293 = vmatprep.mubr.msk.f32.mxu0 %vm188_vm0, %v1577_v8  ;;  %v1178_v27 = vld [vmem:[%s1564_s9 + $0x51] sm:$0xff] }
  0x1e   : > { %v1593_v12 = vld [vmem:[%s1564_s9 + $0x61] sm:$0xff]  ;;  %1307 = vmatprep.mubr.msk.f32.mxu1 %vm188_vm0, %v1580_v9  ;;  %1344 = vmatprep.subr.mxu0 %v1201_v10  ;;  %v1162_v28 = vld [vmem:[%s1564_s9 + $0x70] sm:$0xff] }
  0x1f   : > { %v172_v13 = vld [vmem:[%s1564_s9 + $0x60] sm:$0xff]  ;;  %1358 = vmatprep.subr.mxu1 %v1218_v11  ;;  %1294 = vmatmul.mubr.msk.f32.gmra.mxu0 %vm188_vm0, %v1593_v12  ;;  %v1179_v29 = vld [vmem:[%s1564_s9 + $0x71] sm:$0xff] }
  0x20   : > { %v182_v14 = vld [vmem:[%s1564_s9 + $0x81] sm:$0xff]  ;;  %1308 = vmatmul.mubr.msk.f32.gmra.mxu1 %vm188_vm0, %v172_v13  ;;  %v1163_v30 = vld [vmem:[%s1564_s9 + $0x90] sm:$0xff] }
  0x21   : > { %v173_v15 = vld [vmem:[%s1564_s9 + $0x80] sm:$0xff]  ;;  %1296 = vmatprep.mubr.msk.f32.mxu0 %vm188_vm0, %v182_v14  ;;  %v1180_v31 = vld [vmem:[%s1564_s9 + $0x91] sm:$0xff] }
  0x22   : > { %1310 = vmatprep.mubr.msk.f32.mxu1 %vm188_vm0, %v173_v15  ;;  %v183_v16 = vld [vmem:[%s1564_s9 + $0xa1] sm:$0xff]  ;;  %v1164_v32 = vld [vmem:[%s1564_s9 + $0xb0] sm:$0xff] }
  0x23   : > { %v174_v17 = vld [vmem:[%s1564_s9 + $0xa0] sm:$0xff]  ;;  %1297 = vmatmul.mubr.msk.f32.gmra.mxu0 %vm188_vm0, %v183_v16  ;;  %v1181_v33 = vld [vmem:[%s1564_s9 + $0xb1] sm:$0xff] }
  0x24   : > { %v184_v18 = vld [vmem:[%s1564_s9 + $0xc1] sm:$0xff]  ;;  %1311 = vmatmul.mubr.msk.f32.gmra.mxu1 %vm188_vm0, %v174_v17  ;;  %v1165_v34 = vld [vmem:[%s1564_s9 + $0xd0] sm:$0xff] }
  0x25   : > { %v175_v19 = vld [vmem:[%s1564_s9 + $0xc0] sm:$0xff]  ;;  %1299 = vmatprep.mubr.msk.f32.mxu0 %vm188_vm0, %v184_v18  ;;  %v1182_v35 = vld [vmem:[%s1564_s9 + $0xd1] sm:$0xff] }
  0x26   : > { %1313 = vmatprep.mubr.msk.f32.mxu1 %vm188_vm0, %v175_v19  ;;  %v185_v20 = vld [vmem:[%s1564_s9 + $0xe1] sm:$0xff]  ;;  %v1166_v36 = vld [vmem:[%s1564_s9 + $0xf0] sm:$0xff] }
  0x27   : > { %v176_v21 = vld [vmem:[%s1564_s9 + $0xe0] sm:$0xff]  ;;  %1300 = vmatmul.mubr.msk.f32.gmra.mxu0 %vm188_vm0, %v185_v20  ;;  %v1183_v37 = vld [vmem:[%s1564_s9 + $0xf1] sm:$0xff] }
  0x28   : > { %1314 = vmatmul.mubr.msk.f32.gmra.mxu1 %vm188_vm0, %v176_v21  ;;  %1318 = vmatprep.mubr.msk.f32.mxu0 %vm188_vm0, %v1159_v22  ;;  %v1200_v38 = vld [vmem:[%s1564_s9 + $0x100] sm:$0xff] }
  0x29   : > { %1332 = vmatprep.mubr.msk.f32.mxu1 %vm188_vm0, %v1176_v23  ;;  %v1217_v39 = vld [vmem:[%s1564_s9 + $0x101] sm:$0xff]  ;;  %s1420_s9 = scalar_lea.vmem %s1419_s8, 2048 }
  0x2a   : > { %p1422_p1 = scmp.lt.s32.totalorder %s1420_s9, %s1414_s6 }
  0x2b   : > { %1319 = vmatmul.mubr.msk.f32.vlgmr.msra.gmra.mxu0 %vm188_vm0, %v1160_v24  ;;  %v1227_v24 = vld [vmem:[%s1743_s2] ss:$0 sm:$0xff] }
  0x2c   : > { %1333 = vmatmul.mubr.msk.f32.vlgmr.msra.gmra.mxu1 %vm188_vm0, %v1177_v25  ;;  %1345 = vmatpush3.msra.mxu0 %v1201_v10  ;;  %p1423_p2 = por %p1422_p1, %p1421_p0 }
  0x2d   : > { %1359 = vmatpush3.msra.mxu1 %v1218_v11  ;;  %1321 = vmatprep.mubr.msk.f32.mxu0 %vm188_vm0, %v1161_v26 }
  0x2e   : > { %1335 = vmatprep.mubr.msk.f32.mxu1 %vm188_vm0, %v1178_v27  ;;  %p1424_p3 = pnand %p1423_p2, %p1417_p13 }
  0x2f   : > { %1322 = vmatmul.mubr.msk.f32.gmra.mxu0 %vm188_vm0, %v1162_v28 }
  0x30   : > { %1336 = vmatmul.mubr.msk.f32.gmra.mxu1 %vm188_vm0, %v1179_v29  ;;  %1324 = vmatprep.mubr.msk.f32.mxu0 %vm188_vm0, %v1163_v30 }
  0x31   : > { %1338 = vmatprep.mubr.msk.f32.mxu1 %vm188_vm0, %v1180_v31 }
  0x33   : > { %1325 = vmatmul.mubr.msk.f32.gmra.mxu0 %vm188_vm0, %v1164_v32 }
  0x34   : > { %1339 = vmatmul.mubr.msk.f32.gmra.mxu1 %vm188_vm0, %v1181_v33  ;;  %1327 = vmatprep.mubr.msk.f32.mxu0 %vm188_vm0, %v1165_v34 }
  0x35   : > { %1341 = vmatprep.mubr.msk.f32.mxu1 %vm188_vm0, %v1182_v35 }
  0x37   : > { %1328 = vmatmul.mubr.msk.f32.gmra.mxu0 %vm188_vm0, %v1166_v36 }
  0x38   : > { %1342 = vmatmul.mubr.msk.f32.gmra.mxu1 %vm188_vm0, %v1183_v37  ;;  %1346 = vmatprep.mubr.msk.f32.mxu0 %vm188_vm0, %v1574_v7 }
  0x39   : > { %1360 = vmatprep.mubr.msk.f32.mxu1 %vm188_vm0, %v1569_v6 }
  0x3b   : > { %1347 = vmatmul.mubr.msk.f32.vlgmr.msra.gmra.mxu0 %vm188_vm0, %v1580_v9 }
  0x3c   : > { %1361 = vmatmul.mubr.msk.f32.vlgmr.msra.gmra.mxu1 %vm188_vm0, %v1577_v8  ;;  %1349 = vmatprep.mubr.msk.f32.mxu0 %vm188_vm0, %v172_v13 }
  0x3d   : > { %1363 = vmatprep.mubr.msk.f32.mxu1 %vm188_vm0, %v1593_v12 }
  0x3f   : > { %1350 = vmatmul.mubr.msk.f32.gmra.mxu0 %vm188_vm0, %v173_v15 }
  0x40   : > { %1364 = vmatmul.mubr.msk.f32.gmra.mxu1 %vm188_vm0, %v182_v14  ;;  %1352 = vmatprep.mubr.msk.f32.mxu0 %vm188_vm0, %v174_v17 }
  0x41   : > { %1366 = vmatprep.mubr.msk.f32.mxu1 %vm188_vm0, %v183_v16 }
  0x43   : > { %1353 = vmatmul.mubr.msk.f32.gmra.mxu0 %vm188_vm0, %v175_v19 }
  0x44   : > { %1367 = vmatmul.mubr.msk.f32.gmra.mxu1 %vm188_vm0, %v184_v18  ;;  %1355 = vmatprep.mubr.msk.f32.mxu0 %vm188_vm0, %v176_v21 }
  0x45   : > { %1369 = vmatprep.mubr.msk.f32.mxu1 %vm188_vm0, %v185_v20 }
  0x47   : > { %1356 = vmatmul.mubr.msk.f32.gmra.mxu0 %vm188_vm0, %v1200_v38 }
  0x48   : > { %1370 = vmatmul.mubr.msk.f32.gmra.mxu1 %vm188_vm0, %v1217_v39 }
  0xdb   : > { %v1292_v40 = vpop.f32.mrf.mxu0 }
  0xdc   : > { %v1306_v41 = vpop.f32.mrf.mxu1 }
  0xdd   : > { %v279_v42 = vpop.f32.mrf.mxu0  ;;  %v414_v2 = vadd.f32 %v1306_v41, %v1292_v40 }
  0xde   : > { %v408_v43 = vpop.f32.mrf.mxu1 }
  0xdf   : > { %v1295_v44 = vpop.f32.mrf.mxu0  ;;  %v409_v5 = vadd.f32 %v408_v43, %v279_v42 }
  0xe0   : > { %v1309_v45 = vpop.f32.mrf.mxu1 }
  0xe1   : > { %v289_v46 = vpop.f32.mrf.mxu0  ;;  %v424_v9 = vadd.f32 %v1309_v45, %v1295_v44 }
  0xe2   : > { %v418_v47 = vpop.f32.mrf.mxu1 }
  0xe3   : > { %v1298_v48 = vpop.f32.mrf.mxu0  ;;  %v419_v13 = vadd.f32 %v418_v47, %v289_v46 }
  0xe4   : > { %v1312_v49 = vpop.f32.mrf.mxu1 }
  0xe5   : > { %v299_v50 = vpop.f32.mrf.mxu0  ;;  %v434_v16 = vadd.f32 %v1312_v49, %v1298_v48 }
  0xe6   : > { %v428_v51 = vpop.f32.mrf.mxu1 }
  0xe7   : > { %v1301_v52 = vpop.f32.mrf.mxu0  ;;  %v429_v22 = vadd.f32 %v428_v51, %v299_v50 }
  0xe8   : > { %v1315_v53 = vpop.f32.mrf.mxu1 }
  0xe9   : > { %v309_v54 = vpop.f32.mrf.mxu0  ;;  %v444_v30 = vadd.f32 %v1315_v53, %v1301_v52 }
  0xea   : > { %v438_v55 = vpop.f32.mrf.mxu1 }
  0xeb   : > { %v1320_v56 = vpop.f32.mrf.mxu0  ;;  %v439_v38 = vadd.f32 %v438_v55, %v309_v54 }
  0xec   : > { %v1334_v57 = vpop.f32.mrf.mxu1  ;;  %v588_v6 = vadd.f32 %v1320_v56, %v414_v2 }
  0xed   : > { %v548_v58 = vpop.f32.mrf.mxu0 }
  0xee   : > { %v695_v59 = vpop.f32.mrf.mxu1  ;;  %v587_v10 = vadd.f32 %v548_v58, %v409_v5  ;;  %v735_v14 = vadd.f32 %v1334_v57, %v588_v6 }
  0xef   : > { %v1323_v60 = vpop.f32.mrf.mxu0 }
  0xf0   : > { %v1337_v61 = vpop.f32.mrf.mxu1  ;;  %v590_v15 = vadd.f32 %v1323_v60, %v424_v9  ;;  %v734_v19 = vadd.f32 %v695_v59, %v587_v10 }
  0xf1   : > { %v558_v62 = vpop.f32.mrf.mxu0 }
  0xf2   : > { %v705_v63 = vpop.f32.mrf.mxu1  ;;  %v589_v20 = vadd.f32 %v558_v62, %v419_v13  ;;  %v737_v27 = vadd.f32 %v1337_v61, %v590_v15 }
  0xf3   : > { %v1326_v0 = vpop.f32.mrf.mxu0 }
  0xf4   : > { %v1340_v1 = vpop.f32.mrf.mxu1  ;;  %v592_v23 = vadd.f32 %v1326_v0, %v434_v16  ;;  %v736_v34 = vadd.f32 %v705_v63, %v589_v20 }
  0xf5   : > { %v568_v3 = vpop.f32.mrf.mxu0 }
  0xf6   : > { %v715_v4 = vpop.f32.mrf.mxu1  ;;  %v591_v31 = vadd.f32 %v568_v3, %v429_v22  ;;  %v739_v39 = vadd.f32 %v1340_v1, %v592_v23 }
  0xf7   : > { %v1329_v7 = vpop.f32.mrf.mxu0 }
  0xf8   : > { %v1343_v8 = vpop.f32.mrf.mxu1  ;;  %v594_v42 = vadd.f32 %v1329_v7, %v444_v30  ;;  %v738_v46 = vadd.f32 %v715_v4, %v591_v31 }
  0xf9   : > { %v578_v11 = vpop.f32.mrf.mxu0 }
  0xfa   : > { %v725_v12 = vpop.f32.mrf.mxu1  ;;  %v593_v49 = vadd.f32 %v578_v11, %v439_v38  ;;  %v741_v55 = vadd.f32 %v1343_v8, %v594_v42 }
  0xfb   : > { %v1348_v17 = vpop.f32.mrf.mxu0 }
  0xfc   : > { %v1362_v18 = vpop.f32.mrf.mxu1  ;;  %v883_v21 = vadd.f32 %v1348_v17, %v735_v14  ;;  %v740_v61 = vadd.f32 %v725_v12, %v593_v49 }
  0xfd   : > { %v843_v25 = vpop.f32.mrf.mxu0 }
  0xfe   : > { %v990_v26 = vpop.f32.mrf.mxu1  ;;  %v1030_v28 = vadd.f32 %v1362_v18, %v883_v21  ;;  %v882_v29 = vadd.f32 %v843_v25, %v734_v19 }
  0xff   : > { %v1351_v32 = vpop.f32.mrf.mxu0 }
 0x100   : > { %v1365_v33 = vpop.f32.mrf.mxu1  ;;  %v1045_v35 = vadd.f32 %v1227_v24, %v1030_v28  ;;  %v1029_v36 = vadd.f32 %v990_v26, %v882_v29  ;;  %v885_v37 = vadd.f32 %v1351_v32, %v737_v27 }
 0x101   : > { %v853_v40 = vpop.f32.mrf.mxu0 }
 0x102   : > { %v1000_v41 = vpop.f32.mrf.mxu1  ;;  %1053 = vst [vmem:[%s1680_s27 + $0x8] sm:$0xff] %v1045_v35  ;;  %v1044_v43 = vadd.f32 %v1227_v24, %v1029_v36  ;;  %v1032_v44 = vadd.f32 %v1365_v33, %v885_v37  ;;  %v884_v45 = vadd.f32 %v853_v40, %v736_v34 }
 0x103   : > { %v1354_v47 = vpop.f32.mrf.mxu0 }
 0x104   : > { %v1368_v48 = vpop.f32.mrf.mxu1  ;;  %1052 = vst [vmem:[%s1680_s27] sm:$0xff] %v1044_v43  ;;  %v1047_v50 = vadd.f32 %v1227_v24, %v1032_v44  ;;  %v1031_v51 = vadd.f32 %v1000_v41, %v884_v45  ;;  %v887_v52 = vadd.f32 %v1354_v47, %v739_v39 }
 0x105   : > { %v863_v53 = vpop.f32.mrf.mxu0 }
 0x106   : > { %v1010_v54 = vpop.f32.mrf.mxu1  ;;  %1055 = vst [vmem:[%s1680_s27 + $0x18] sm:$0xff] %v1047_v50  ;;  %v1046_v56 = vadd.f32 %v1227_v24, %v1031_v51  ;;  %v1034_v57 = vadd.f32 %v1368_v48, %v887_v52  ;;  %v886_v58 = vadd.f32 %v863_v53, %v738_v46 }
 0x107   : > { %v1357_v59 = vpop.f32.mrf.mxu0 }
 0x108   : > { %v1371_v60 = vpop.f32.mrf.mxu1  ;;  %1054 = vst [vmem:[%s1680_s27 + $0x10] sm:$0xff] %v1046_v56  ;;  %v1049_v62 = vadd.f32 %v1227_v24, %v1034_v57  ;;  %v1033_v63 = vadd.f32 %v1010_v54, %v886_v58  ;;  %v889_v0 = vadd.f32 %v1357_v59, %v741_v55 }
 0x109   : > { %v873_v1 = vpop.f32.mrf.mxu0 }
 0x10a   : > { %1057 = vst [vmem:[%s1680_s27 + $0x28] sm:$0xff] %v1049_v62  ;;  %v1048_v2 = vadd.f32 %v1227_v24, %v1033_v63  ;;  %v1036_v3 = vadd.f32 %v1371_v60, %v889_v0  ;;  %v888_v4 = vadd.f32 %v873_v1, %v740_v61  ;;  %v1020_v5 = vpop.f32.mrf.mxu1 }
 0x10c   : > { %1056 = vst [vmem:[%s1680_s27 + $0x20] sm:$0xff] %v1048_v2  ;;  %v1051_v6 = vadd.f32 %v1227_v24, %v1036_v3  ;;  %v1035_v7 = vadd.f32 %v1020_v5, %v888_v4 }
 0x10e   : > { %1059 = vst [vmem:[%s1680_s27 + $0x38] sm:$0xff] %v1051_v6  ;;  %v1050_v8 = vadd.f32 %v1227_v24, %v1035_v7 }
 0x110   : > { %1058 = vst [vmem:[%s1680_s27 + $0x30] sm:$0xff] %v1050_v8 }
 0x111   : > { %1427 = shalt.err (!%p1424_p3)
}
 0x112   : > { %s1428_s10 = scalar_lea.hbm %s1693_s5, 1024  ;;  %s1432_s19 = scalar_lea.hbm %s1744_s3, 2048 }
 0x113   : > { %p1429_p4 = scmp.ne.s32.totalorder %s1693_s5, %s1428_s10  ;;  %p1433_p9 = scmp.lt.s32.totalorder %s1693_s5, %s1744_s3 }
 0x114   : > { %p1434_p10 = scmp.lt.s32.totalorder %s1432_s19, %s1428_s10 }
 0x115   : > { %p1430_p7 = pnand %p1429_p4, %p1537_p5 }
 0x116   : > { %p1435_p11 = por %p1434_p10, %p1433_p9 }
 0x117   : > { %p1431_p8 = pneg %p1430_p7 }
 0x119   : > { %p1436_p12 = pnand %p1435_p11, %p1431_p8 }
 0x11b   : > { %1439 = shalt.err (!%p1436_p12)
}
 0x11c   : > { %s1477_s25 = smov 128   ;;  %s1478_s26 = smov 8  }
 0x11d   : > { %1373 = dma.vmem_to_hbm [thread:$0]  (%p1537_p5), %s1695_s29, 1024, %s1693_s5, %s1701_s16, %s1477_s25, %s1477_s25, %s1478_s26  }
 0x11e PF: > { %p1379_p13 = scmp.ge.s32.totalorder %s1474_s15, 2  ;;  %s1089_s27 = sand.u32 1, %s1462_s12  }
 0x11f   : > { %s1090_s28 = scalar_lea.sflag [#allocation3], %s1089_s27 }
 0x120   : > { %p1376_p0 = pnand %p1379_p13, %p1541_p6 }
 0x122   : > { %p1377_p1 = pneg %p1376_p0 }
 0x124   : > { %1457 = dma.done.wait (%p1377_p1), %s1090_s28, 1024  }
 0x125   : > { %1459 = vsyncadd (%p1377_p1), %s1090_s28, 4294966272  ;;  %p13_p2 = scmp.ge.s32.totalorder %s1524_s18, 4   ;;  %s1747_s12 = smov %s1466_s13 }
 0x126   : > { %s1748_s13 = smov %s1470_s14  ;;  %s1749_s14 = smov %s1535_s21 }
 0x127   : > { %s1750_s15 = smov %s1524_s18  ;;  %15 = sbr.rel (!%p13_p2) target bundleno = 3 (0x3), region = 74 }
 0x12c   :  { %1095 = vsyncpa [#allocation3], 1 }
 0x12d   :  { %1097 = vsyncpa [#allocation3 + $0x1], 1 }

</bundles_post_ra>
